<compile_context>
chip_gen: v7x
topology: tpu7x:2x2x1
jax: 0.10.0
libtpu: 0.0.40
codegen_flags: <defaults>
</compile_context>

<pallas_src>
import jax
import jax.numpy as jnp
from jax.experimental import pallas as pl
from jax.experimental.pallas import tpu as pltpu

D_IN = 768
D_H1 = 256
D_H2 = 32
D_OUT = 1


def _round_up(x, m):
    return (x + m - 1) // m * m


def _head_kernel(x_ref, w1_ref, b1_ref, w2_ref, b2_ref, w3r_ref, b3_ref, o_ref):
    cdt = w1_ref.dtype                      # MXU input dtype (bf16 by default)
    x = x_ref[...].astype(cdt)              # in-VMEM cast; no-op if x already bf16

    # Layer 1: Linear(768 -> 256) + ReLU  (MXU, f32 accumulation)
    h1 = jnp.dot(x, w1_ref[...], preferred_element_type=jnp.float32)
    h1 = jnp.maximum(h1 + b1_ref[...], 0.0)
    # Dropout(p=0.3): identity in eval mode.

    # Layer 2: Linear(256 -> 32) + ReLU  (MXU, f32 accumulation)
    h2 = jnp.dot(h1.astype(cdt), w2_ref[...], preferred_element_type=jnp.float32)
    h2 = jnp.maximum(h2 + b2_ref[...], 0.0)
    # Dropout(p=0.2): identity in eval mode.

    # Layer 3: Linear(32 -> 1) on the VPU/XLU (f32 broadcast-multiply + lane
    # reduce) instead of a 1-column MXU matmul.
    out = jnp.sum(h2 * w3r_ref[...], axis=-1, keepdims=True) + b3_ref[...]
    o_ref[...] = out.astype(o_ref.dtype)


def _pick_row_tile(B, tm):
    """Clamp the row tile to the batch; keep >= 2 grid steps for v7x megacore."""
    if B >= 512:
        # v7x has 2 TensorCores sharing the parallel grid axis: never collapse a
        # large batch into a single grid step.
        tm = min(tm, _round_up(pl.cdiv(B, 2), 8))
    if tm >= B:
        return B            # one full-batch block (B need not be 8-aligned)
    return _round_up(tm, 8)


def classification_head(x, w1, b1, w2, b2, w3, b3, *,
                        compute_dtype=jnp.bfloat16,
                        out_dtype=jnp.float32,
                        tm=None,
                        vmem_limit_bytes=None):
    """x: (B, 768). Weights stored (in, out); biases stored (1, out); w3 is (32, 1)."""
    B, d_in = x.shape
    assert d_in == D_IN

    # Weights hit the MXU in `compute_dtype` (bf16 by default). They are < 1 MB
    # total and fetched once (constant index_maps), so casting here is free.
    w1c = w1.astype(compute_dtype)
    w2c = w2.astype(compute_dtype)
    # Biases and the 32->1 weight row stay f32 (negligible size, best precision).
    b1r = b1.reshape(1, D_H1).astype(jnp.float32)
    b2r = b2.reshape(1, D_H2).astype(jnp.float32)
    w3r = w3.reshape(1, D_H2).astype(jnp.float32)
    b3r = b3.reshape(1, D_OUT).astype(jnp.float32)

    # Default row tile sized so 2x (double-buffered) x tiles + resident weights +
    # in-kernel intermediates fit under the smallest default scoped VMEM (16 MiB
    # on v5e).  Sweep `tm` / `vmem_limit_bytes` upward on v6e (128 MiB VMEM).
    if tm is None:
        tm = 2048 if jnp.dtype(x.dtype).itemsize <= 2 else 1024
    tm_eff = _pick_row_tile(B, tm)
    grid = (pl.cdiv(B, tm_eff),)        # ragged last block; no jnp.pad round trip

    return pl.pallas_call(
        _head_kernel,
        out_shape=jax.ShapeDtypeStruct((B, D_OUT), out_dtype),
        grid_spec=pltpu.PrefetchScalarGridSpec(
            num_scalar_prefetch=0,
            grid=grid,
            in_specs=[
                pl.BlockSpec((tm_eff, D_IN), lambda i: (i, 0)),  # x tile (streamed)
                pl.BlockSpec((D_IN, D_H1), lambda i: (0, 0)),    # W1 (resident)
                pl.BlockSpec((1, D_H1), lambda i: (0, 0)),       # b1
                pl.BlockSpec((D_H1, D_H2), lambda i: (0, 0)),    # W2
                pl.BlockSpec((1, D_H2), lambda i: (0, 0)),       # b2
                pl.BlockSpec((1, D_H2), lambda i: (0, 0)),       # W3 as a row
                pl.BlockSpec((1, D_OUT), lambda i: (0, 0)),      # b3
            ],
            out_specs=pl.BlockSpec((tm_eff, D_OUT), lambda i: (i, 0)),
        ),
        compiler_params=pltpu.CompilerParams(
            dimension_semantics=("parallel",),
            vmem_limit_bytes=vmem_limit_bytes,
        ),
    )(x, w1c, b1r, w2c, b2r, w3r, b3r)


def init_params(key):
    """Deterministic init, PyTorch-default-like (uniform +/- 1/sqrt(fan_in))."""
    ks = jax.random.split(key, 6)

    def lin(kw, kb, fan_in, fan_out):
        bound = 1.0 / jnp.sqrt(fan_in)
        w = jax.random.uniform(kw, (fan_in, fan_out), jnp.float32, -bound, bound)
        b = jax.random.uniform(kb, (1, fan_out), jnp.float32, -bound, bound)
        return w, b

    w1, b1 = lin(ks[0], ks[1], D_IN, D_H1)
    w2, b2 = lin(ks[2], ks[3], D_H1, D_H2)
    w3, b3 = lin(ks[4], ks[5], D_H2, D_OUT)
    return w1, b1, w2, b2, w3, b3


def reference(x, w1, b1, w2, b2, w3, b3):
    h = jnp.maximum(x @ w1 + b1, 0.0)
    h = jnp.maximum(h @ w2 + b2, 0.0)
    return h @ w3 + b3


if __name__ == "__main__":
    key = jax.random.PRNGKey(0)
    k_x1, k_x2, k_p = jax.random.split(key, 3)
    params = init_params(k_p)

    # Case 1: tiny, non-8-aligned batch on the exact f32 path (tight check).
    x1 = jax.random.normal(k_x1, (12, D_IN), dtype=jnp.float32)
    out1 = jax.block_until_ready(
        classification_head(x1, *params, compute_dtype=jnp.float32))
    ref1 = reference(x1, *params)
    assert out1.shape == (12, D_OUT)
    assert jnp.allclose(out1, ref1, atol=1e-4, rtol=1e-4)

    # Case 2: multi-step ragged grid (300 rows, tm=128 -> 3 steps, last partial)
    # on the default bf16 compute path (f32 accumulation) -> looser tolerance.
    x2 = jax.random.normal(k_x2, (300, D_IN), dtype=jnp.float32)
    out2 = jax.block_until_ready(classification_head(x2, *params, tm=128))
    ref2 = reference(x2, *params)
    assert out2.shape == (300, D_OUT)
    assert jnp.allclose(out2, ref2, atol=2e-2, rtol=2e-2)

    print("KERNEL_OK")
</pallas_src>

<mosaic_0001>
module attributes {stable_mosaic.version = 11 : i64} {
  func.func @_head_kernel(%arg0: i32, %arg1: memref<12x768xf32, #tpu.memory_space<vmem>>, %arg2: memref<768x256xf32, #tpu.memory_space<vmem>>, %arg3: memref<1x256xf32, #tpu.memory_space<vmem>>, %arg4: memref<256x32xf32, #tpu.memory_space<vmem>>, %arg5: memref<1x32xf32, #tpu.memory_space<vmem>>, %arg6: memref<1x32xf32, #tpu.memory_space<vmem>>, %arg7: memref<1x1xf32, #tpu.memory_space<vmem>>, %arg8: memref<12x1xf32, #tpu.memory_space<vmem>>) attributes {dimension_semantics = [#tpu.dimension_semantics<parallel>], iteration_bounds = array<i64: 1>, scalar_prefetch = 0 : i64, scratch_operands = 0 : i64, tpu.core_type = #tpu.core_type<tc>, window_params = [{transform_indices = @transform_0, window_bounds = array<i64: 12, 768>}, {pipeline_mode = #tpu.pipeline_mode<synchronous>, transform_indices = @transform_1, window_bounds = array<i64: 768, 256>}, {pipeline_mode = #tpu.pipeline_mode<synchronous>, transform_indices = @transform_2, window_bounds = array<i64: 1, 256>}, {pipeline_mode = #tpu.pipeline_mode<synchronous>, transform_indices = @transform_3, window_bounds = array<i64: 256, 32>}, {pipeline_mode = #tpu.pipeline_mode<synchronous>, transform_indices = @transform_4, window_bounds = array<i64: 1, 32>}, {pipeline_mode = #tpu.pipeline_mode<synchronous>, transform_indices = @transform_5, window_bounds = array<i64: 1, 32>}, {pipeline_mode = #tpu.pipeline_mode<synchronous>, transform_indices = @transform_6, window_bounds = array<i64: 1, 1>}, {transform_indices = @transform_7, window_bounds = array<i64: 12, 1>}]} {
    %c0 = arith.constant 0 : index
    %c0_0 = arith.constant 0 : index
    %0 = vector.load %arg1[%c0, %c0_0] : memref<12x768xf32, #tpu.memory_space<vmem>>, vector<12x768xf32>
    %c0_1 = arith.constant 0 : index
    %c0_2 = arith.constant 0 : index
    %1 = vector.load %arg2[%c0_1, %c0_2] : memref<768x256xf32, #tpu.memory_space<vmem>>, vector<768x256xf32>
    %cst = arith.constant dense<0.000000e+00> : vector<12x256xf32>
    %2 = tpu.matmul %0, %1, %cst {dimension_numbers = #tpu.dot_dimension_numbers<[1], [0], [0], [1], [0, 0, 1, 1], [], []>} : vector<12x768xf32>, vector<768x256xf32>, vector<12x256xf32> -> vector<12x256xf32>
    %c0_3 = arith.constant 0 : index
    %c0_4 = arith.constant 0 : index
    %3 = vector.load %arg3[%c0_3, %c0_4] : memref<1x256xf32, #tpu.memory_space<vmem>>, vector<1x256xf32>
    %4 = vector.broadcast %3 : vector<1x256xf32> to vector<12x256xf32>
    %5 = arith.addf %2, %4 : vector<12x256xf32>
    %cst_5 = arith.constant 0.000000e+00 : f32
    %6 = vector.broadcast %cst_5 : f32 to vector<12x256xf32>
    %7 = arith.maximumf %5, %6 : vector<12x256xf32>
    %c0_6 = arith.constant 0 : index
    %c0_7 = arith.constant 0 : index
    %8 = vector.load %arg4[%c0_6, %c0_7] : memref<256x32xf32, #tpu.memory_space<vmem>>, vector<256x32xf32>
    %cst_8 = arith.constant dense<0.000000e+00> : vector<12x32xf32>
    %9 = tpu.matmul %7, %8, %cst_8 {dimension_numbers = #tpu.dot_dimension_numbers<[1], [0], [0], [1], [0, 0, 1, 1], [], []>} : vector<12x256xf32>, vector<256x32xf32>, vector<12x32xf32> -> vector<12x32xf32>
    %c0_9 = arith.constant 0 : index
    %c0_10 = arith.constant 0 : index
    %10 = vector.load %arg5[%c0_9, %c0_10] : memref<1x32xf32, #tpu.memory_space<vmem>>, vector<1x32xf32>
    %11 = vector.broadcast %10 : vector<1x32xf32> to vector<12x32xf32>
    %12 = arith.addf %9, %11 : vector<12x32xf32>
    %cst_11 = arith.constant 0.000000e+00 : f32
    %13 = vector.broadcast %cst_11 : f32 to vector<12x32xf32>
    %14 = arith.maximumf %12, %13 : vector<12x32xf32>
    %c0_12 = arith.constant 0 : index
    %c0_13 = arith.constant 0 : index
    %15 = vector.load %arg6[%c0_12, %c0_13] : memref<1x32xf32, #tpu.memory_space<vmem>>, vector<1x32xf32>
    %16 = vector.broadcast %15 : vector<1x32xf32> to vector<12x32xf32>
    %17 = arith.mulf %14, %16 : vector<12x32xf32>
    %cst_14 = arith.constant dense<0.000000e+00> : vector<12xf32>
    %18 = vector.multi_reduction <add>, %17, %cst_14 [1] : vector<12x32xf32> to vector<12xf32>
    %19 = vector.shape_cast %18 : vector<12xf32> to vector<12x1xf32>
    %c0_15 = arith.constant 0 : index
    %c0_16 = arith.constant 0 : index
    %20 = vector.load %arg7[%c0_15, %c0_16] : memref<1x1xf32, #tpu.memory_space<vmem>>, vector<1x1xf32>
    %21 = vector.broadcast %20 : vector<1x1xf32> to vector<12x1xf32>
    %22 = arith.addf %19, %21 : vector<12x1xf32>
    %c0_17 = arith.constant 0 : index
    %c0_18 = arith.constant 0 : index
    %23 = vector.load %arg8[%c0_17, %c0_18] : memref<12x1xf32, #tpu.memory_space<vmem>>, vector<12x1xf32>
    tpu.vector_store %arg8[%c0_17, %c0_18], %22 {strides = array<i32>} : memref<12x1xf32, #tpu.memory_space<vmem>>, vector<12x1xf32>,
    return
  }
  func.func @transform_0(%arg0: i32) -> (i32, i32) {
    %c0_i32 = arith.constant 0 : i32
    %c0_i32_0 = arith.constant 0 : i32
    return %arg0, %c0_i32 : i32, i32
  }
  func.func @transform_1(%arg0: i32) -> (i32, i32) {
    %c0_i32 = arith.constant 0 : i32
    %c0_i32_0 = arith.constant 0 : i32
    %c0_i32_1 = arith.constant 0 : i32
    return %c0_i32, %c0_i32_0 : i32, i32
  }
  func.func @transform_2(%arg0: i32) -> (i32, i32) {
    %c0_i32 = arith.constant 0 : i32
    %c0_i32_0 = arith.constant 0 : i32
    %c0_i32_1 = arith.constant 0 : i32
    return %c0_i32, %c0_i32_0 : i32, i32
  }
  func.func @transform_3(%arg0: i32) -> (i32, i32) {
    %c0_i32 = arith.constant 0 : i32
    %c0_i32_0 = arith.constant 0 : i32
    %c0_i32_1 = arith.constant 0 : i32
    return %c0_i32, %c0_i32_0 : i32, i32
  }
  func.func @transform_4(%arg0: i32) -> (i32, i32) {
    %c0_i32 = arith.constant 0 : i32
    %c0_i32_0 = arith.constant 0 : i32
    %c0_i32_1 = arith.constant 0 : i32
    return %c0_i32, %c0_i32_0 : i32, i32
  }
  func.func @transform_5(%arg0: i32) -> (i32, i32) {
    %c0_i32 = arith.constant 0 : i32
    %c0_i32_0 = arith.constant 0 : i32
    %c0_i32_1 = arith.constant 0 : i32
    return %c0_i32, %c0_i32_0 : i32, i32
  }
  func.func @transform_6(%arg0: i32) -> (i32, i32) {
    %c0_i32 = arith.constant 0 : i32
    %c0_i32_0 = arith.constant 0 : i32
    %c0_i32_1 = arith.constant 0 : i32
    return %c0_i32, %c0_i32_0 : i32, i32
  }
  func.func @transform_7(%arg0: i32) -> (i32, i32) {
    %c0_i32 = arith.constant 0 : i32
    %c0_i32_0 = arith.constant 0 : i32
    return %arg0, %c0_i32 : i32, i32
  }
}

</mosaic_0001>

<bundles_post_ra>
// kernel: tpu_custom_call.1
= control target key start
LH: loop header
LB: loop body
LE: loop exit
PB: predicated region body
PF: predicated region fallthrough
CT: control target
= control target key end

     0   :  { %s1153_s0 = inlined_call_operand.vmem [shape: f32[12,768], index: 0, kind: input, shape index: {}]   ;;  %s1154_s1 = inlined_call_operand.hbm [shape: f32[768,256], index: 1, kind: input, shape index: {}]   ;;  %s1155_s2 = inlined_call_operand.vmem [shape: f32[1,256], index: 2, kind: input, shape index: {}]   ;;  %s1156_s3 = inlined_call_operand.vmem [shape: f32[256,32], index: 3, kind: input, shape index: {}]   ;;  %s1157_s4 = inlined_call_operand.vmem [shape: f32[1,32], index: 4, kind: input, shape index: {}]   ;;  %s1158_s5 = inlined_call_operand.vmem [shape: f32[1,32], index: 5, kind: input, shape index: {}]   ;;  %s1159_s6 = inlined_call_operand.<no memory space> [shape: f32[1,1], index: 6, kind: input, shape index: {}]   ;;  %s1160_s7 = inlined_call_operand.vmem [shape: f32[12,1], index: 7, kind: output, shape index: {}]  }
   0x1   :  { %v12_v0 = vstv %s1159_s6 }
   0x2   :  { %13 = vst [vmem:[#allocation2] sm:$0x1] %v12_v0 }
   0x3   :  { %14 = vsyncpa [#allocation4], 0  ;;  %s948_s26 = smov [#allocation3]   ;;  %s924_s30 = scalar_lea.hbm %s1154_s1, 24576 }
   0x4   :  { %s22_s27 = sshll.u32 %s948_s26, 4  ;;  %p925_p0 = scmp.ne.s32.totalorder %s1154_s1, %s924_s30  ;;  %s23_s27 = int_to_ptr.vmem [resolvable:$true] %s22_s27 }
   0x5   :  { %p928_p1 = scmp.lt.u32.totalorder %s924_s30, %s1154_s1 }
   0x7   :  { %p930_p2 = pnand %p928_p1, %p925_p0 }
   0x9   :  { %933 = shalt.err (!%p930_p2)
}
   0xa   :  { %s934_s6 = scalar_lea.vmem %s23_s27, 24576  ;;  %p939_p4 = scmp.lt.s32.totalorder %s23_s27, %s23_s27 }
   0xb   :  { %p935_p3 = scmp.ne.s32.totalorder %s23_s27, %s934_s6  ;;  %p940_p5 = scmp.lt.s32.totalorder %s934_s6, %s934_s6 }
   0xd   :  { %p941_p6 = por %p940_p5, %p939_p4 }
   0xf   :  { %p942_p7 = pnand %p941_p6, %p935_p3 }
  0x11   :  { %945 = shalt.err (!%p942_p7)
}
  0x12   :  { %s949_s12 = smov 256   ;;  %s950_s13 = smov 16  }
  0x13   :  { %28 = dma.hbm_to_vmem [thread:$0]  %s1154_s1, 24576, %s23_s27, [#allocation4], %s949_s12, %s949_s12, %s950_s13  }
  0x14   :  { %946 = dma.done.wait [#allocation4], 24576  }
  0x15   :  { %947 = vsyncadd [#allocation4], 4294942720  ;;  %v119_v1 = vld [vmem:[#allocation3 + $0x208] sm:$0xff]  ;;  %v121_v2 = vld [vmem:[#allocation3 + $0x218] sm:$0xff]  ;;  %vm618_vm0 = vcmask 261120   ;;  %vm622_vm1 = vcmask 257024  }
  0x16   :  { %v118_v3 = vld [vmem:[#allocation3 + $0x200] sm:$0xff]  ;;  %v749_v4 = vpack.c.bf16 %v121_v2, %v119_v1  ;;  %v120_v5 = vld [vmem:[#allocation3 + $0x210] sm:$0xff]  ;;  %v123_v6 = vld [vmem:[#allocation3 + $0x228] sm:$0xff]  ;;  %vm635_vm2 = vcmask 7168   ;;  %vm637_vm3 = vcmask 3072  }
  0x17   :  { %v125_v7 = vld [vmem:[#allocation3 + $0x238] sm:$0xff]  ;;  %v751_v8 = vpack.c.bf16 %v120_v5, %v118_v3  ;;  %v122_v10 = vld [vmem:[#allocation3 + $0x220] sm:$0xff]  ;;  %v124_v11 = vld [vmem:[#allocation3 + $0x230] sm:$0xff] }
  0x18   :  { %v753_v9 = vpack.c.bf16 %v125_v7, %v123_v6  ;;  %v127_v12 = vld [vmem:[#allocation3 + $0x248] sm:$0xff]  ;;  %750 = vmatprep.subr.bf16.mxu0 %v749_v4  ;;  %v129_v13 = vld [vmem:[#allocation3 + $0x258] sm:$0xff]  ;;  %v755_v14 = vpack.c.bf16 %v124_v11, %v122_v10  ;;  %v126_v16 = vld [vmem:[#allocation3 + $0x240] sm:$0xff] }
  0x19   :  { %752 = vmatpush1.bf16.msra.mxu0 %v751_v8  ;;  %v757_v15 = vpack.c.bf16 %v129_v13, %v127_v12  ;;  %v128_v17 = vld [vmem:[#allocation3 + $0x250] sm:$0xff]  ;;  %v131_v18 = vld [vmem:[#allocation3 + $0x268] sm:$0xff]  ;;  %v133_v19 = vld [vmem:[#allocation3 + $0x278] sm:$0xff] }
  0x1a   :  { %754 = vmatprep.subr.bf16.mxu0 %v753_v9  ;;  %v759_v20 = vpack.c.bf16 %v128_v17, %v126_v16  ;;  %v761_v21 = vpack.c.bf16 %v133_v19, %v131_v18  ;;  %v130_v22 = vld [vmem:[#allocation3 + $0x260] sm:$0xff]  ;;  %v132_v23 = vld [vmem:[#allocation3 + $0x270] sm:$0xff]  ;;  %v135_v24 = vld [vmem:[#allocation3 + $0x288] sm:$0xff] }
  0x1b   :  { %v137_v25 = vld [vmem:[#allocation3 + $0x298] sm:$0xff]  ;;  %v763_v26 = vpack.c.bf16 %v132_v23, %v130_v22  ;;  %v134_v28 = vld [vmem:[#allocation3 + $0x280] sm:$0xff]  ;;  %v136_v29 = vld [vmem:[#allocation3 + $0x290] sm:$0xff] }
  0x1c   :  { %v765_v27 = vpack.c.bf16 %v137_v25, %v135_v24  ;;  %v139_v30 = vld [vmem:[#allocation3 + $0x2a8] sm:$0xff]  ;;  %v141_v31 = vld [vmem:[#allocation3 + $0x2b8] sm:$0xff]  ;;  %v767_v32 = vpack.c.bf16 %v136_v29, %v134_v28  ;;  %v138_v34 = vld [vmem:[#allocation3 + $0x2a0] sm:$0xff] }
  0x1d   :  { %756 = vmatpush1.bf16.msra.mxu0 %v755_v14  ;;  %v769_v33 = vpack.c.bf16 %v141_v31, %v139_v30  ;;  %v140_v35 = vld [vmem:[#allocation3 + $0x2b0] sm:$0xff]  ;;  %v143_v36 = vld [vmem:[#allocation3 + $0x2c8] sm:$0xff]  ;;  %v145_v37 = vld [vmem:[#allocation3 + $0x2d8] sm:$0xff] }
  0x1e   :  { %758 = vmatprep.subr.bf16.mxu0 %v757_v15  ;;  %v771_v38 = vpack.c.bf16 %v140_v35, %v138_v34  ;;  %v142_v39 = vld [vmem:[#allocation3 + $0x2c0] sm:$0xff]  ;;  %v144_v40 = vld [vmem:[#allocation3 + $0x2d0] sm:$0xff]  ;;  %v55_v41 = vld [vmem:[#allocation3 + $0x8] sm:$0xff]  ;;  %v773_v42 = vpack.c.bf16 %v145_v37, %v143_v36 }
  0x1f   :  { %v147_v43 = vld [vmem:[#allocation3 + $0x2e8] sm:$0xff]  ;;  %v149_v44 = vld [vmem:[#allocation3 + $0x2f8] sm:$0xff]  ;;  %v54_v47 = vld [vmem:[#allocation3] sm:$0xff]  ;;  %v775_v52 = vpack.c.bf16 %v144_v40, %v142_v39 }
  0x20   :  { %v57_v45 = vld [vmem:[#allocation3 + $0x18] sm:$0xff]  ;;  %v56_v48 = vld [vmem:[#allocation3 + $0x10] sm:$0xff]  ;;  %v59_v51 = vld [vmem:[#allocation3 + $0x28] sm:$0xff]  ;;  %v777_v55 = vpack.c.bf16 %v149_v44, %v147_v43 }
  0x21   :  { %760 = vmatpush1.bf16.msra.mxu0 %v759_v20  ;;  %v685_v46 = vpack.c.bf16 %v57_v45, %v55_v41  ;;  %v45_v49 = vld [vmem:[%s1153_s0 + $0x18] sm:$0xff]  ;;  %v687_v50 = vpack.c.bf16 %v56_v48, %v54_v47  ;;  %v146_v53 = vld [vmem:[#allocation3 + $0x2e0] sm:$0xff]  ;;  %v151_v60 = vld [vmem:[#allocation3 + $0x308] sm:$0xff] }
  0x22   :  { %762 = vmatprep.subr.bf16.mxu0 %v761_v21  ;;  %399 = vmatprep.mubr.f32.mxu0 %v45_v49  ;;  %v61_v54 = vld [vmem:[#allocation3 + $0x38] sm:$0xff]  ;;  %v148_v56 = vld [vmem:[#allocation3 + $0x2f0] sm:$0xff]  ;;  %v58_v58 = vld [vmem:[#allocation3 + $0x20] sm:$0xff] }
  0x23   :  { %686 = vmatprep.subr.bf16.mxu1 %v685_v46  ;;  %v689_v57 = vpack.c.bf16 %v61_v54, %v59_v51  ;;  %v60_v59 = vld [vmem:[#allocation3 + $0x30] sm:$0xff]  ;;  %v153_v61 = vld [vmem:[#allocation3 + $0x318] sm:$0xff]  ;;  %v63_v63 = vld [vmem:[#allocation3 + $0x48] sm:$0xff]  ;;  %v779_v1 = vpack.c.bf16 %v148_v56, %v146_v53 }
  0x24   :  { %688 = vmatpush1.bf16.msra.mxu1 %v687_v50  ;;  %v691_v62 = vpack.c.bf16 %v60_v59, %v58_v58  ;;  %v65_v0 = vld [vmem:[#allocation3 + $0x58] sm:$0xff]  ;;  %v150_v2 = vld [vmem:[#allocation3 + $0x300] sm:$0xff]  ;;  %v64_v5 = vld [vmem:[#allocation3 + $0x50] sm:$0xff]  ;;  %v781_v6 = vpack.c.bf16 %v153_v61, %v151_v60 }
  0x25   :  { %764 = vmatpush1.bf16.msra.mxu0 %v763_v26  ;;  %690 = vmatprep.subr.bf16.mxu1 %v689_v57  ;;  %v693_v3 = vpack.c.bf16 %v65_v0, %v63_v63  ;;  %v62_v4 = vld [vmem:[#allocation3 + $0x40] sm:$0xff]  ;;  %v152_v7 = vld [vmem:[#allocation3 + $0x310] sm:$0xff]  ;;  %v67_v9 = vld [vmem:[#allocation3 + $0x68] sm:$0xff] }
  0x26   :  { %766 = vmatprep.subr.bf16.mxu0 %v765_v27  ;;  %v695_v8 = vpack.c.bf16 %v64_v5, %v62_v4  ;;  %v69_v10 = vld [vmem:[#allocation3 + $0x78] sm:$0xff]  ;;  %v155_v11 = vld [vmem:[#allocation3 + $0x328] sm:$0xff]  ;;  %v66_v14 = vld [vmem:[#allocation3 + $0x60] sm:$0xff]  ;;  %v783_v16 = vpack.c.bf16 %v152_v7, %v150_v2 }
  0x27   :  { %v157_v12 = vld [vmem:[#allocation3 + $0x338] sm:$0xff]  ;;  %v697_v13 = vpack.c.bf16 %v69_v10, %v67_v9  ;;  %v68_v15 = vld [vmem:[#allocation3 + $0x70] sm:$0xff]  ;;  %v71_v17 = vld [vmem:[#allocation3 + $0x88] sm:$0xff] }
  0x28   :  { %692 = vmatpush1.bf16.msra.mxu1 %v691_v62  ;;  %v73_v18 = vld [vmem:[#allocation3 + $0x98] sm:$0xff]  ;;  %v785_v19 = vpack.c.bf16 %v157_v12, %v155_v11  ;;  %v154_v20 = vld [vmem:[#allocation3 + $0x320] sm:$0xff]  ;;  %v156_v21 = vld [vmem:[#allocation3 + $0x330] sm:$0xff]  ;;  %v699_v23 = vpack.c.bf16 %v68_v15, %v66_v14 }
  0x29   :  { %768 = vmatpush1.bf16.msra.mxu0 %v767_v32  ;;  %694 = vmatprep.subr.bf16.mxu1 %v693_v3  ;;  %v159_v22 = vld [vmem:[#allocation3 + $0x348] sm:$0xff]  ;;  %v161_v24 = vld [vmem:[#allocation3 + $0x358] sm:$0xff]  ;;  %v701_v25 = vpack.c.bf16 %v73_v18, %v71_v17  ;;  %v70_v26 = vld [vmem:[#allocation3 + $0x80] sm:$0xff]  ;;  %v787_v30 = vpack.c.bf16 %v156_v21, %v154_v20 }
  0x2a   :  { %770 = vmatprep.subr.bf16.mxu0 %v769_v33  ;;  %v72_v27 = vld [vmem:[#allocation3 + $0x90] sm:$0xff]  ;;  %v75_v28 = vld [vmem:[#allocation3 + $0xa8] sm:$0xff]  ;;  %v77_v29 = vld [vmem:[#allocation3 + $0xb8] sm:$0xff]  ;;  %v789_v31 = vpack.c.bf16 %v161_v24, %v159_v22 }
  0x2b   :  { %v158_v32 = vld [vmem:[#allocation3 + $0x340] sm:$0xff]  ;;  %v160_v33 = vld [vmem:[#allocation3 + $0x350] sm:$0xff]  ;;  %v163_v34 = vld [vmem:[#allocation3 + $0x368] sm:$0xff]  ;;  %v703_v35 = vpack.c.bf16 %v72_v27, %v70_v26  ;;  %v705_v37 = vpack.c.bf16 %v77_v29, %v75_v28 }
  0x2c   :  { %696 = vmatpush1.bf16.msra.mxu1 %v695_v8  ;;  %v165_v36 = vld [vmem:[#allocation3 + $0x378] sm:$0xff]  ;;  %v76_v39 = vld [vmem:[#allocation3 + $0xb0] sm:$0xff]  ;;  %v79_v40 = vld [vmem:[#allocation3 + $0xc8] sm:$0xff] }
  0x2d   :  { %772 = vmatpush1.bf16.msra.mxu0 %v771_v38  ;;  %698 = vmatprep.subr.bf16.mxu1 %v697_v13  ;;  %v74_v38 = vld [vmem:[#allocation3 + $0xa0] sm:$0xff]  ;;  %v81_v41 = vld [vmem:[#allocation3 + $0xd8] sm:$0xff]  ;;  %v793_v43 = vpack.c.bf16 %v165_v36, %v163_v34  ;;  %v164_v45 = vld [vmem:[#allocation3 + $0x370] sm:$0xff] }
  0x2e   :  { %774 = vmatprep.subr.bf16.mxu0 %v773_v42  ;;  %v791_v42 = vpack.c.bf16 %v160_v33, %v158_v32  ;;  %v162_v44 = vld [vmem:[#allocation3 + $0x360] sm:$0xff]  ;;  %v167_v46 = vld [vmem:[#allocation3 + $0x388] sm:$0xff]  ;;  %v707_v47 = vpack.c.bf16 %v76_v39, %v74_v38  ;;  %v169_v48 = vld [vmem:[#allocation3 + $0x398] sm:$0xff]  ;;  %v709_v49 = vpack.c.bf16 %v81_v41, %v79_v40 }
  0x2f   :  { %v78_v50 = vld [vmem:[#allocation3 + $0xc0] sm:$0xff]  ;;  %v80_v51 = vld [vmem:[#allocation3 + $0xd0] sm:$0xff]  ;;  %v85_v53 = vld [vmem:[#allocation3 + $0xf8] sm:$0xff]  ;;  %v795_v54 = vpack.c.bf16 %v164_v45, %v162_v44 }
  0x30   :  { %700 = vmatpush1.bf16.msra.mxu1 %v699_v23  ;;  %v166_v56 = vld [vmem:[#allocation3 + $0x380] sm:$0xff]  ;;  %v168_v57 = vld [vmem:[#allocation3 + $0x390] sm:$0xff]  ;;  %v171_v58 = vld [vmem:[#allocation3 + $0x3a8] sm:$0xff]  ;;  %v711_v59 = vpack.c.bf16 %v80_v51, %v78_v50 }
  0x31   :  { %776 = vmatpush1.bf16.msra.mxu0 %v775_v52  ;;  %702 = vmatprep.subr.bf16.mxu1 %v701_v25  ;;  %v83_v52 = vld [vmem:[#allocation3 + $0xe8] sm:$0xff]  ;;  %v173_v60 = vld [vmem:[#allocation3 + $0x3b8] sm:$0xff]  ;;  %v82_v62 = vld [vmem:[#allocation3 + $0xe0] sm:$0xff]  ;;  %v799_v2 = vpack.c.bf16 %v168_v57, %v166_v56 }
  0x32   :  { %778 = vmatprep.subr.bf16.mxu0 %v777_v55  ;;  %v797_v55 = vpack.c.bf16 %v169_v48, %v167_v46  ;;  %v713_v61 = vpack.c.bf16 %v85_v53, %v83_v52  ;;  %v84_v63 = vld [vmem:[#allocation3 + $0xf0] sm:$0xff]  ;;  %v87_v0 = vld [vmem:[#allocation3 + $0x108] sm:$0xff]  ;;  %v801_v3 = vpack.c.bf16 %v173_v60, %v171_v58  ;;  %v170_v4 = vld [vmem:[#allocation3 + $0x3a0] sm:$0xff] }
  0x33   :  { %v172_v5 = vld [vmem:[#allocation3 + $0x3b0] sm:$0xff]  ;;  %v715_v7 = vpack.c.bf16 %v84_v63, %v82_v62  ;;  %v177_v8 = vld [vmem:[#allocation3 + $0x3d8] sm:$0xff]  ;;  %v86_v10 = vld [vmem:[#allocation3 + $0x100] sm:$0xff] }
  0x34   :  { %704 = vmatpush1.bf16.msra.mxu1 %v703_v35  ;;  %v88_v11 = vld [vmem:[#allocation3 + $0x110] sm:$0xff]  ;;  %v91_v12 = vld [vmem:[#allocation3 + $0x128] sm:$0xff]  ;;  %v93_v13 = vld [vmem:[#allocation3 + $0x138] sm:$0xff]  ;;  %v803_v14 = vpack.c.bf16 %v172_v5, %v170_v4 }
  0x35   :  { %780 = vmatpush1.bf16.msra.mxu0 %v779_v1  ;;  %706 = vmatprep.subr.bf16.mxu1 %v705_v37  ;;  %v89_v1 = vld [vmem:[#allocation3 + $0x118] sm:$0xff]  ;;  %v176_v17 = vld [vmem:[#allocation3 + $0x3d0] sm:$0xff]  ;;  %v179_v18 = vld [vmem:[#allocation3 + $0x3e8] sm:$0xff]  ;;  %v721_v21 = vpack.c.bf16 %v93_v13, %v91_v12 }
  0x36   :  { %782 = vmatprep.subr.bf16.mxu0 %v781_v6  ;;  %v175_v6 = vld [vmem:[#allocation3 + $0x3c8] sm:$0xff]  ;;  %v717_v9 = vpack.c.bf16 %v89_v1, %v87_v0  ;;  %v181_v20 = vld [vmem:[#allocation3 + $0x3f8] sm:$0xff]  ;;  %v90_v22 = vld [vmem:[#allocation3 + $0x120] sm:$0xff] }
  0x37   :  { %v805_v15 = vpack.c.bf16 %v177_v8, %v175_v6  ;;  %v92_v23 = vld [vmem:[#allocation3 + $0x130] sm:$0xff]  ;;  %v95_v24 = vld [vmem:[#allocation3 + $0x148] sm:$0xff]  ;;  %v97_v25 = vld [vmem:[#allocation3 + $0x158] sm:$0xff]  ;;  %v809_v27 = vpack.c.bf16 %v181_v20, %v179_v18 }
  0x38   :  { %708 = vmatpush1.bf16.msra.mxu1 %v707_v47  ;;  %v178_v28 = vld [vmem:[#allocation3 + $0x3e0] sm:$0xff]  ;;  %v180_v29 = vld [vmem:[#allocation3 + $0x3f0] sm:$0xff]  ;;  %v185_v32 = vld [vmem:[#allocation3 + $0x418] sm:$0xff]  ;;  %v725_v33 = vpack.c.bf16 %v97_v25, %v95_v24 }
  0x39   :  { %784 = vmatpush1.bf16.msra.mxu0 %v783_v16  ;;  %710 = vmatprep.subr.bf16.mxu1 %v709_v49  ;;  %v174_v16 = vld [vmem:[#allocation3 + $0x3c0] sm:$0xff]  ;;  %v96_v35 = vld [vmem:[#allocation3 + $0x150] sm:$0xff]  ;;  %v99_v36 = vld [vmem:[#allocation3 + $0x168] sm:$0xff]  ;;  %v811_v38 = vpack.c.bf16 %v180_v29, %v178_v28 }
  0x3a   :  { %786 = vmatprep.subr.bf16.mxu0 %v785_v19  ;;  %v719_v19 = vpack.c.bf16 %v88_v11, %v86_v10  ;;  %v807_v26 = vpack.c.bf16 %v176_v17, %v174_v16  ;;  %v94_v34 = vld [vmem:[#allocation3 + $0x140] sm:$0xff]  ;;  %v101_v37 = vld [vmem:[#allocation3 + $0x178] sm:$0xff]  ;;  %v184_v41 = vld [vmem:[#allocation3 + $0x410] sm:$0xff] }
  0x3b   :  { %v182_v40 = vld [vmem:[#allocation3 + $0x400] sm:$0xff]  ;;  %v189_v44 = vld [vmem:[#allocation3 + $0x438] sm:$0xff]  ;;  %v729_v45 = vpack.c.bf16 %v101_v37, %v99_v36  ;;  %v100_v47 = vld [vmem:[#allocation3 + $0x170] sm:$0xff] }
  0x3c   :  { %712 = vmatpush1.bf16.msra.mxu1 %v711_v59  ;;  %v98_v46 = vld [vmem:[#allocation3 + $0x160] sm:$0xff]  ;;  %v103_v48 = vld [vmem:[#allocation3 + $0x188] sm:$0xff]  ;;  %v105_v49 = vld [vmem:[#allocation3 + $0x198] sm:$0xff]  ;;  %v815_v52 = vpack.c.bf16 %v184_v41, %v182_v40 }
  0x3d   :  { %788 = vmatpush1.bf16.msra.mxu0 %v787_v30  ;;  %714 = vmatprep.subr.bf16.mxu1 %v713_v61  ;;  %v183_v30 = vld [vmem:[#allocation3 + $0x408] sm:$0xff]  ;;  %v186_v53 = vld [vmem:[#allocation3 + $0x420] sm:$0xff]  ;;  %v731_v57 = vpack.c.bf16 %v100_v47, %v98_v46  ;;  %v193_v59 = vld [vmem:[#allocation3 + $0x458] sm:$0xff]  ;;  %v733_v60 = vpack.c.bf16 %v105_v49, %v103_v48 }
  0x3e   :  { %790 = vmatprep.subr.bf16.mxu0 %v789_v31  ;;  %v723_v31 = vpack.c.bf16 %v92_v23, %v90_v22  ;;  %v813_v39 = vpack.c.bf16 %v185_v32, %v183_v30  ;;  %v43_v50 = vld [vmem:[%s1153_s0 + $0x8] sm:$0xff]  ;;  %v44_v51 = vld [vmem:[%s1153_s0 + $0x10] sm:$0xff]  ;;  %v109_v0 = vld [vmem:[#allocation3 + $0x1b8] sm:$0xff] }
  0x3f   :  { %322 = vmatprep.mubr.f32.mxu1 %v43_v50  ;;  %v191_v56 = vld [vmem:[#allocation3 + $0x448] sm:$0xff]  ;;  %v102_v61 = vld [vmem:[#allocation3 + $0x180] sm:$0xff]  ;;  %v104_v62 = vld [vmem:[#allocation3 + $0x190] sm:$0xff] }
  0x40   :  { %716 = vmatpush1.bf16.msra.mxu1 %v715_v7  ;;  %v51_v58 = vld [vmem:[%s1153_s0 + $0x48] sm:$0xf]  ;;  %v821_v4 = vpack.c.bf16 %v193_v59, %v191_v56  ;;  %v192_v5 = vld [vmem:[#allocation3 + $0x450] sm:$0xff]  ;;  %v735_v7 = vpack.c.bf16 %v104_v62, %v102_v61  ;;  %v509_v37 = vld [vmem:[%s1156_s3 + $0x80] sm:$0xff] }
  0x41   :  { %792 = vmatpush1.bf16.msra.mxu0 %v791_v42  ;;  %718 = vmatprep.subr.bf16.mxu1 %v717_v9  ;;  %v187_v42 = vld [vmem:[#allocation3 + $0x428] sm:$0xff]  ;;  %v197_v9 = vld [vmem:[#allocation3 + $0x478] sm:$0xff]  ;;  %v106_v11 = vld [vmem:[#allocation3 + $0x1a0] sm:$0xff] }
  0x42   :  { %794 = vmatprep.subr.bf16.mxu0 %v793_v43  ;;  %v727_v43 = vpack.c.bf16 %v96_v35, %v94_v34  ;;  %v107_v63 = vld [vmem:[#allocation3 + $0x1a8] sm:$0xff]  ;;  %v108_v12 = vld [vmem:[#allocation3 + $0x1b0] sm:$0xff]  ;;  %v194_v17 = vld [vmem:[#allocation3 + $0x460] sm:$0xff] }
  0x43   :  { %v195_v6 = vld [vmem:[#allocation3 + $0x468] sm:$0xff]  ;;  %v737_v10 = vpack.c.bf16 %v109_v0, %v107_v63  ;;  %v196_v18 = vld [vmem:[#allocation3 + $0x470] sm:$0xff]  ;;  %v739_v20 = vpack.c.bf16 %v108_v12, %v106_v11  ;;  %v110_v23 = vld [vmem:[#allocation3 + $0x1c0] sm:$0xff] }
  0x44   :  { %720 = vmatpush1.bf16.msra.mxu1 %v719_v19  ;;  %v47_v8 = vld [vmem:[%s1153_s0 + $0x28] sm:$0xff]  ;;  %v825_v16 = vpack.c.bf16 %v197_v9, %v195_v6  ;;  %v112_v24 = vld [vmem:[#allocation3 + $0x1d0] sm:$0xff]  ;;  %v493_v47 = vld [vmem:[%s1156_s3] sm:$0xff] }
  0x45   :  { %796 = vmatpush1.bf16.msra.mxu0 %v795_v54  ;;  %722 = vmatprep.subr.bf16.mxu1 %v721_v21  ;;  %v817_v54 = vpack.c.bf16 %v189_v44, %v187_v42  ;;  %v111_v13 = vld [vmem:[#allocation3 + $0x1c8] sm:$0xff]  ;;  %v201_v21 = vld [vmem:[#allocation3 + $0x498] sm:$0xff]  ;;  %v198_v29 = vld [vmem:[#allocation3 + $0x480] sm:$0xff]  ;;  %v743_v32 = vpack.c.bf16 %v112_v24, %v110_v23 }
  0x46   :  { %798 = vmatprep.subr.bf16.mxu0 %v797_v55  ;;  %v188_v55 = vld [vmem:[#allocation3 + $0x430] sm:$0xff]  ;;  %v199_v19 = vld [vmem:[#allocation3 + $0x488] sm:$0xff]  ;;  %v114_v35 = vld [vmem:[#allocation3 + $0x1e0] sm:$0xff] }
  0x47   :  { %v819_v1 = vpack.c.bf16 %v188_v55, %v186_v53  ;;  %v115_v25 = vld [vmem:[#allocation3 + $0x1e8] sm:$0xff]  ;;  %v829_v28 = vpack.c.bf16 %v201_v21, %v199_v19  ;;  %v200_v30 = vld [vmem:[#allocation3 + $0x490] sm:$0xff]  ;;  %v202_v41 = vld [vmem:[#allocation3 + $0x4a0] sm:$0xff] }
  0x48   :  { %724 = vmatpush1.bf16.msra.mxu1 %v723_v31  ;;  %v203_v31 = vld [vmem:[#allocation3 + $0x4a8] sm:$0xff]  ;;  %v116_v36 = vld [vmem:[#allocation3 + $0x1f0] sm:$0xff]  ;;  %v206_v53 = vld [vmem:[#allocation3 + $0x4c0] sm:$0xff] }
  0x49   :  { %800 = vmatpush1.bf16.msra.mxu0 %v799_v2  ;;  %726 = vmatprep.subr.bf16.mxu1 %v725_v33  ;;  %v190_v2 = vld [vmem:[#allocation3 + $0x440] sm:$0xff]  ;;  %v205_v33 = vld [vmem:[#allocation3 + $0x4b8] sm:$0xff]  ;;  %v204_v42 = vld [vmem:[#allocation3 + $0x4b0] sm:$0xff] }
  0x4a   :  { %802 = vmatprep.subr.bf16.mxu0 %v801_v3  ;;  %v50_v3 = vld [vmem:[%s1153_s0 + $0x40] sm:$0xf]  ;;  %v833_v40 = vpack.c.bf16 %v205_v33, %v203_v31  ;;  %v207_v44 = vld [vmem:[#allocation3 + $0x4c8] sm:$0xff]  ;;  %v835_v49 = vpack.c.bf16 %v204_v42, %v202_v41  ;;  %v496_v62 = vld [vmem:[%s1156_s3 + $0x18] sm:$0xff] }
  0x4b   :  { %v494_v48 = vld [vmem:[%s1156_s3 + $0x8] sm:$0xff]  ;;  %v511_v50 = vld [vmem:[%s1156_s3 + $0x90] sm:$0xff]  ;;  %v42_v55 = vld [vmem:[%s1153_s0] sm:$0xff] }
  0x4c   :  { %728 = vmatpush1.bf16.msra.mxu1 %v727_v43  ;;  %v747_v43 = vpack.c.bf16 %v116_v36, %v114_v35  ;;  %v211_v56 = vld [vmem:[#allocation3 + $0x4e8] sm:$0xff]  ;;  %v879_v59 = vpack.c.bf16 %v494_v48, %v493_v47  ;;  %v513_v0 = vld [vmem:[%s1156_s3 + $0xa0] sm:$0xff]  ;;  %v500_v23 = vld [vmem:[%s1156_s3 + $0x38] sm:$0xff] }
  0x4d   :  { %804 = vmatpush1.bf16.msra.mxu0 %v803_v14  ;;  %730 = vmatprep.subr.bf16.mxu1 %v729_v45  ;;  %v113_v14 = vld [vmem:[#allocation3 + $0x1d8] sm:$0xff]  ;;  %v495_v61 = vld [vmem:[%s1156_s3 + $0x10] sm:$0xff]  ;;  %v498_v11 = vld [vmem:[%s1156_s3 + $0x28] sm:$0xff] }
  0x4e   :  { %806 = vmatprep.subr.bf16.mxu0 %v805_v15  ;;  %v823_v15 = vpack.c.bf16 %v192_v5, %v190_v2  ;;  %v741_v22 = vpack.c.bf16 %v113_v14, %v111_v13  ;;  %v209_v45 = vld [vmem:[#allocation3 + $0x4d8] sm:$0xff]  ;;  %v48_v5 = vld [vmem:[%s1153_s0 + $0x30] sm:$0xf]  ;;  %v502_v35 = vld [vmem:[%s1156_s3 + $0x48] sm:$0xff] }
  0x4f   :  { %v215_v6 = vld [vmem:[#allocation3 + $0x508] sm:$0xff]  ;;  %v516_v14 = vld [vmem:[%s1156_s3 + $0xb8] sm:$0xff] }
  0x50   :  { %732 = vmatpush1.bf16.msra.mxu1 %v731_v57  ;;  %v213_v57 = vld [vmem:[#allocation3 + $0x4f8] sm:$0xff]  ;;  %v515_v13 = vld [vmem:[%s1156_s3 + $0xb0] sm:$0xff] }
  0x51   :  { %808 = vmatpush1.bf16.msra.mxu0 %v807_v26  ;;  %734 = vmatprep.subr.bf16.mxu1 %v733_v60  ;;  %v117_v26 = vld [vmem:[#allocation3 + $0x1f8] sm:$0xff]  ;;  %v841_v2 = vpack.c.bf16 %v213_v57, %v211_v56  ;;  %v889_v21 = vpack.c.bf16 %v516_v14, %v515_v13  ;;  %v224_v41 = vld [vmem:[#allocation3 + $0x550] sm:$0xff]  ;;  %v227_v42 = vld [vmem:[#allocation3 + $0x568] sm:$0xff] }
  0x52   :  { %810 = vmatprep.subr.bf16.mxu0 %v809_v27  ;;  %v827_v27 = vpack.c.bf16 %v196_v18, %v194_v17  ;;  %v745_v34 = vpack.c.bf16 %v117_v26, %v115_v25  ;;  %v216_v17 = vld [vmem:[#allocation3 + $0x510] sm:$0xff]  ;;  %v219_v18 = vld [vmem:[#allocation3 + $0x528] sm:$0xff]  ;;  %v221_v19 = vld [vmem:[#allocation3 + $0x538] sm:$0xff] }
  0x53   :  { %v517_v25 = vld [vmem:[%s1156_s3 + $0xc0] sm:$0xff]  ;;  %v518_v26 = vld [vmem:[%s1156_s3 + $0xc8] sm:$0xff]  ;;  %v504_v47 = vld [vmem:[%s1156_s3 + $0x58] sm:$0xff] }
  0x54   :  { %736 = vmatpush1.bf16.msra.mxu1 %v735_v7  ;;  %v217_v7 = vld [vmem:[#allocation3 + $0x518] sm:$0xff]  ;;  %v893_v33 = vpack.c.bf16 %v518_v26, %v517_v25  ;;  %v230_v57 = vld [vmem:[#allocation3 + $0x580] sm:$0xff]  ;;  %v507_v26 = vld [vmem:[%s1156_s3 + $0x70] sm:$0xff] }
  0x55   :  { %812 = vmatpush1.bf16.msra.mxu0 %v811_v38  ;;  %738 = vmatprep.subr.bf16.mxu1 %v737_v10  ;;  %v510_v38 = vld [vmem:[%s1156_s3 + $0x88] sm:$0xff]  ;;  %v497_v10 = vld [vmem:[%s1156_s3 + $0x20] sm:$0xff] }
  0x56   :  { %814 = vmatprep.subr.bf16.mxu0 %v813_v39  ;;  %v831_v39 = vpack.c.bf16 %v200_v30, %v198_v29  ;;  %v877_v46 = vpack.c.bf16 %v510_v38, %v509_v37  ;;  %v220_v29 = vld [vmem:[#allocation3 + $0x530] sm:$0xff]  ;;  %v223_v30 = vld [vmem:[#allocation3 + $0x548] sm:$0xff]  ;;  %v225_v31 = vld [vmem:[#allocation3 + $0x558] sm:$0xff] }
  0x57   :  { %v519_v37 = vld [vmem:[%s1156_s3 + $0xd0] sm:$0xff]  ;;  %v520_v38 = vld [vmem:[%s1156_s3 + $0xd8] sm:$0xff]  ;;  %v46_v14 = vld [vmem:[%s1153_s0 + $0x20] sm:$0xff] }
  0x58   :  { %400 = vmatmul.mubr.f32.vlgmr.msra.gmra.mrb[0].mxu0 %v44_v51  ;;  %740 = vmatpush1.bf16.msra.mxu1 %v739_v20  ;;  %v512_v51 = vld [vmem:[%s1156_s3 + $0x98] sm:$0xff]  ;;  %v887_v20 = vpack.c.bf16 %v498_v11, %v497_v10  ;;  %v242_v11 = vld [vmem:[#allocation3 + $0x5e0] sm:$0xff] }
  0x59   :  { %816 = vmatpush1.bf16.msra.mxu0 %v815_v52  ;;  %405 = vmatprep.mubr.f32.mxu0 %v51_v58  ;;  %v837_v52 = vpack.c.bf16 %v209_v45, %v207_v44  ;;  %v49_v58 = vld [vmem:[%s1153_s0 + $0x38] sm:$0xf]  ;;  %v881_v60 = vpack.c.bf16 %v512_v51, %v511_v50  ;;  %v897_v45 = vpack.c.bf16 %v520_v38, %v519_v37  ;;  %v226_v50 = vld [vmem:[#allocation3 + $0x560] sm:$0xff] }
  0x5a   :  { %818 = vmatprep.subr.bf16.mxu0 %v817_v54  ;;  %742 = vmatprep.subr.bf16.mxu1 %v741_v22  ;;  %v208_v54 = vld [vmem:[#allocation3 + $0x4d0] sm:$0xff] }
  0x5b   :  { %v839_v63 = vpack.c.bf16 %v208_v54, %v206_v53  ;;  %v499_v22 = vld [vmem:[%s1156_s3 + $0x30] sm:$0xff]  ;;  %v233_v53 = vld [vmem:[#allocation3 + $0x598] sm:$0xff] }
  0x5c   :  { %406 = vmatmul.mubr.f32.gmra.mrb[2].mxu0 %v50_v3  ;;  %744 = vmatpush1.bf16.msra.mxu1 %v743_v32  ;;  %v210_v3 = vld [vmem:[#allocation3 + $0x4e0] sm:$0xff]  ;;  %v891_v32 = vpack.c.bf16 %v500_v23, %v499_v22  ;;  %v228_v51 = vld [vmem:[#allocation3 + $0x570] sm:$0xff] }
  0x5d   :  { %820 = vmatpush1.bf16.msra.mxu0 %v819_v1  ;;  %476 = vmatprep.mubr.f32.mxu0 %v47_v8  ;;  %v514_v1 = vld [vmem:[%s1156_s3 + $0xa8] sm:$0xff]  ;;  %v883_v8 = vpack.c.bf16 %v496_v62, %v495_v61  ;;  %v523_v23 = vld [vmem:[%s1156_s3 + $0xf0] sm:$0xff] }
  0x5e   :  { %822 = vmatprep.subr.bf16.mxu0 %v821_v4  ;;  %746 = vmatprep.subr.bf16.mxu1 %v745_v34  ;;  %v212_v4 = vld [vmem:[#allocation3 + $0x4f0] sm:$0xff]  ;;  %v885_v9 = vpack.c.bf16 %v514_v1, %v513_v0  ;;  %v501_v34 = vld [vmem:[%s1156_s3 + $0x40] sm:$0xff]  ;;  %v239_v1 = vld [vmem:[#allocation3 + $0x5c8] sm:$0xff] }
  0x5f   :  { %v843_v12 = vpack.c.bf16 %v212_v4, %v210_v3  ;;  %v895_v44 = vpack.c.bf16 %v502_v35, %v501_v34  ;;  %v236_v0 = vld [vmem:[#allocation3 + $0x5b0] sm:$0xff] }
  0x60   :  { %748 = vmatpush1.bf16.msra.mxu1 %v747_v43  ;;  %v229_v43 = vld [vmem:[#allocation3 + $0x578] sm:$0xff] }
  0x61   :  { %824 = vmatpush1.bf16.msra.mxu0 %v823_v15  ;;  %878 = vmatprep.subr.bf16.mxu1 %v877_v46  ;;  %v845_v15 = vpack.c.bf16 %v217_v7, %v215_v6  ;;  %v503_v46 = vld [vmem:[%s1156_s3 + $0x50] sm:$0xff] }
  0x62   :  { %826 = vmatprep.subr.bf16.mxu0 %v825_v16  ;;  %v214_v16 = vld [vmem:[#allocation3 + $0x500] sm:$0xff]  ;;  %v899_v54 = vpack.c.bf16 %v504_v47, %v503_v46  ;;  %v240_v6 = vld [vmem:[#allocation3 + $0x5d0] sm:$0xff]  ;;  %v243_v7 = vld [vmem:[#allocation3 + $0x5e8] sm:$0xff] }
  0x63   :  { %323 = vmatmul.mubr.f32.vlgmr.msra.gmra.mrb[0].mxu1 %v42_v55  ;;  %v847_v24 = vpack.c.bf16 %v216_v17, %v214_v16  ;;  %v859_v55 = vpack.c.bf16 %v228_v51, %v226_v50  ;;  %v52_v16 = vld [vmem:[%s1153_s0 + $0x50] sm:$0xf]  ;;  %v521_v17 = vld [vmem:[%s1156_s3 + $0xe0] sm:$0xff] }
  0x64   :  { %328 = vmatprep.mubr.f32.mxu1 %v49_v58  ;;  %880 = vmatpush3.bf16.msra.mxu1 %v879_v59  ;;  %v232_v58 = vld [vmem:[#allocation3 + $0x590] sm:$0xff]  ;;  %v235_v59 = vld [vmem:[#allocation3 + $0x5a8] sm:$0xff] }
  0x65   :  { %828 = vmatpush1.bf16.msra.mxu0 %v827_v27  ;;  %882 = vmatprep.subr.bf16.mxu1 %v881_v60  ;;  %v849_v27 = vpack.c.bf16 %v221_v19, %v219_v18  ;;  %v237_v60 = vld [vmem:[#allocation3 + $0x5b8] sm:$0xff]  ;;  %v863_v61 = vpack.c.bf16 %v232_v58, %v230_v57  ;;  %v522_v18 = vld [vmem:[%s1156_s3 + $0xe8] sm:$0xff] }
  0x66   :  { %830 = vmatprep.subr.bf16.mxu0 %v829_v28  ;;  %v218_v28 = vld [vmem:[#allocation3 + $0x520] sm:$0xff]  ;;  %v865_v62 = vpack.c.bf16 %v237_v60, %v235_v59  ;;  %v901_v19 = vpack.c.bf16 %v522_v18, %v521_v17  ;;  %v644_v57 = vld [vmem:[%s1157_s4] ss:$0 sm:$0xff] }
  0x67   :  { %329 = vmatmul.mubr.f32.gmra.mrb[2].mxu1 %v48_v5  ;;  %v851_v36 = vpack.c.bf16 %v220_v29, %v218_v28  ;;  %v238_v5 = vld [vmem:[#allocation3 + $0x5c0] sm:$0xff] }
  0x68   :  { %884 = vmatpush3.bf16.msra.mxu1 %v883_v8  ;;  %v245_v8 = vld [vmem:[#allocation3 + $0x5f8] sm:$0xff] }
  0x69   :  { %832 = vmatpush1.bf16.msra.mxu0 %v831_v39  ;;  %886 = vmatprep.subr.bf16.mxu1 %v885_v9  ;;  %v853_v39 = vpack.c.bf16 %v225_v31, %v223_v30  ;;  %v871_v9 = vpack.c.bf16 %v240_v6, %v238_v5  ;;  %v873_v10 = vpack.c.bf16 %v245_v8, %v243_v7  ;;  %v646_v8 = vld [vmem:[#allocation2] ss:$0 sm:$0xff] }
  0x6a   :  { %834 = vmatprep.subr.bf16.mxu0 %v833_v40  ;;  %v222_v40 = vld [vmem:[#allocation3 + $0x540] sm:$0xff] }
  0x6b   :  { %v855_v48 = vpack.c.bf16 %v224_v41, %v222_v40 }
  0x6c   :  { %888 = vmatpush3.bf16.msra.mxu1 %v887_v20  ;;  %v505_v20 = vld [vmem:[%s1156_s3 + $0x60] sm:$0xff] }
  0x6d   :  { %836 = vmatpush1.bf16.msra.mxu0 %v835_v49  ;;  %890 = vmatprep.subr.bf16.mxu1 %v889_v21  ;;  %v857_v49 = vpack.c.bf16 %v229_v43, %v227_v42  ;;  %v506_v21 = vld [vmem:[%s1156_s3 + $0x68] sm:$0xff] }
  0x6e   :  { %838 = vmatprep.subr.bf16.mxu0 %v837_v52  ;;  %v231_v52 = vld [vmem:[#allocation3 + $0x588] sm:$0xff]  ;;  %v903_v22 = vpack.c.bf16 %v506_v21, %v505_v20 }
  0x6f   :  { %v861_v56 = vpack.c.bf16 %v233_v53, %v231_v52 }
  0x70   :  { %892 = vmatpush3.bf16.msra.mxu1 %v891_v32 }
  0x71   :  { %840 = vmatpush1.bf16.msra.mxu0 %v839_v63  ;;  %894 = vmatprep.subr.bf16.mxu1 %v893_v33  ;;  %v234_v63 = vld [vmem:[#allocation3 + $0x5a0] sm:$0xff]  ;;  %v248_v33 = vlaneseq }
  0x72   :  { %842 = vmatprep.subr.bf16.mxu0 %v841_v2  ;;  %v241_v2 = vld [vmem:[#allocation3 + $0x5d8] sm:$0xff]  ;;  %v867_v3 = vpack.c.bf16 %v236_v0, %v234_v63 }
  0x73   :  { %v869_v4 = vpack.c.bf16 %v241_v2, %v239_v1  ;;  %v249_v34 = vshrl.u32 %v248_v33, 7  ;;  %v645_v63 = vld [vmem:[%s1158_s5] ss:$0 sm:$0xff] }
  0x74   :  { %896 = vmatpush3.bf16.msra.mxu1 %v895_v44 }
  0x75   :  { %844 = vmatpush1.bf16.msra.mxu0 %v843_v12  ;;  %898 = vmatprep.subr.bf16.mxu1 %v897_v45  ;;  %v244_v12 = vld [vmem:[#allocation3 + $0x5f0] sm:$0xff]  ;;  %v250_v35 = vsub.s32 0, %v249_v34  ;;  %v254_v37 = vsub.s32 1, %v249_v34 }
  0x76   :  { %846 = vmatprep.subr.bf16.mxu0 %v845_v15  ;;  %v875_v13 = vpack.c.bf16 %v244_v12, %v242_v11  ;;  %v53_v15 = vld [vmem:[%s1153_s0 + $0x58] sm:$0xf] }
  0x78   :  { %900 = vmatpush3.bf16.msra.mxu1 %v899_v54 }
  0x79   :  { %848 = vmatpush1.bf16.msra.mxu0 %v847_v24  ;;  %902 = vmatprep.subr.bf16.mxu1 %v901_v19  ;;  %v524_v24 = vld [vmem:[%s1156_s3 + $0xf8] sm:$0xff] }
  0x7a   :  { %850 = vmatprep.subr.bf16.mxu0 %v849_v27  ;;  %v905_v25 = vpack.c.bf16 %v524_v24, %v523_v23  ;;  %v508_v27 = vld [vmem:[%s1156_s3 + $0x78] sm:$0xff] }
  0x7b   :  { %v907_v28 = vpack.c.bf16 %v508_v27, %v507_v26 }
  0x7c   :  { %904 = vmatpush3.bf16.msra.mxu1 %v903_v22 }
  0x7d   :  { %852 = vmatpush1.bf16.msra.mxu0 %v851_v36  ;;  %906 = vmatprep.subr.bf16.mxu1 %v905_v25  ;;  %v246_v36 = vld [vmem:[%s1155_s2] sm:$0x3] }
  0x7e   :  { %854 = vmatprep.subr.bf16.mxu0 %v853_v39  ;;  %v251_v38 = vrot.slane %v246_v36, %v250_v35  ;;  %v255_v39 = vrot.slane %v246_v36, %v254_v37 }
  0x80   :  { %908 = vmatpush3.bf16.msra.mxu1 %v907_v28 }
  0x81   :  { %856 = vmatpush1.bf16.msra.mxu0 %v855_v48 }
  0x82   :  { %858 = vmatprep.subr.bf16.mxu0 %v857_v49 }
  0x85   :  { %860 = vmatpush1.bf16.msra.mxu0 %v859_v55 }
  0x86   :  { %862 = vmatprep.subr.bf16.mxu0 %v861_v56 }
  0x89   :  { %864 = vmatpush1.bf16.msra.mxu0 %v863_v61 }
  0x8a   :  { %866 = vmatprep.subr.bf16.mxu0 %v865_v62 }
  0x8d   :  { %868 = vmatpush1.bf16.msra.mxu0 %v867_v3 }
  0x8e   :  { %870 = vmatprep.subr.bf16.mxu0 %v869_v4 }
  0x91   :  { %872 = vmatpush1.bf16.msra.mxu0 %v871_v9 }
  0x92   :  { %874 = vmatprep.subr.bf16.mxu0 %v873_v10 }
  0x95   :  { %876 = vmatpush1.bf16.msra.mxu0 %v875_v13 }
  0x98   :  { %477 = vmatmul.mubr.f32.vlgmr.msra.gmra.mrb[0].mxu0 %v46_v14 }
  0x99   :  { %482 = vmatprep.mubr.f32.mxu0 %v53_v15 }
  0x9c   :  { %483 = vmatmul.mubr.f32.gmra.mrb[2].mxu0 %v52_v16 }
 0x136   :  { %v324_v29 = vpop.f32.mrb[0].mxu1 }
 0x137   :  { %v326_v30 = vpop.f32.mrb[1].mxu1  ;;  %v325_v40 = vadd.f32 %v324_v29, %v251_v38 }
 0x138   :  { %v327_v41 = vadd.f32 %v326_v30, %v255_v39 }
 0x13a   :  { %v330_v31 = vpop.f32.mrb[2].mxu1 }
 0x13b   :  { %v332_v32 = vpop.f32.mrb[3].mxu1  ;;  %v331_v44 = vadd.f32 %v330_v31, %v251_v38 }
 0x13c   :  { %v333_v47 = vadd.f32 %v332_v32, %v255_v39 }
 0x16b   :  { %v478_v42 = vpop.f32.mrb[0].mxu0 }
 0x16c   :  { %v910_v43 = vadd.f32 %v478_v42, %v325_v40  ;;  %v480_v45 = vpop.f32.mrb[1].mxu0 }
 0x16d   :  { %v912_v46 = vadd.f32 %v480_v45, %v327_v41 }
 0x16e   :  { %v489_v50 = vmax.f32 %v910_v43, 0.0 }
 0x16f   :  { %v490_v48 = vmax.f32 %v912_v46, 0.0  ;;  %v484_v49 = vpop.f32.mrb[2].mxu0 }
 0x170   :  { %v914_v51 = vadd.f32 %v484_v49, %v331_v44  ;;  %v486_v52 = vpop.f32.mrb[3].mxu0 }
 0x171   :  { %v916_v53 = vadd.f32 %v486_v52, %v333_v47  ;;  %596 = vmatprep.mubr.f32.mxu1 %v490_v48 }
 0x172   :  { %597 = vmatmul.mubr.f32.vlgmr.msra.gmra.mrb[4].mxu1 %v489_v50  ;;  %v491_v55 = vmax.f32 %v914_v51, 0.0 }
 0x173   :  { %v492_v54 = vmax.f32 %v916_v53, 0.0 }
 0x175   :  { %601 = vmatprep.mubr.f32.mxu1 %v492_v54 }
 0x176   :  { %602 = vmatmul.mubr.f32.gmra.mrb[6].mxu1 %v491_v55 }
 0x245   :  { %v679_v56 = vpop.f32.mrb[4].mxu1 }
 0x246   :  { %v680_v58 = vpop.f32.mrb[5].mxu1 }
 0x247   :  { %v681_v59 = vadd.f32 %v680_v58, %v679_v56 }
 0x249   :  { %v599_v60 = vadd.f32 %v681_v59, %v644_v57  ;;  %v682_v61 = vpop.f32.mrb[6].mxu1 }
 0x24a   :  { %v683_v62 = vpop.f32.mrb[7].mxu1 }
 0x24b   :  { %v607_v0 = vmax.f32 %v599_v60, 0.0  ;;  %v684_v1 = vadd.f32 %v683_v62, %v682_v61 }
 0x24d   :  { %v604_v2 = vadd.f32 %v684_v1, %v644_v57  ;;  %v616_v3 = vmul.f32 %v645_v63, %v607_v0 }
 0x24f   :  { %v608_v4 = vmax.f32 %v604_v2, 0.0  ;;  %v619_v5 = vsel %vm618_vm0, %v616_v3, 0.0 }
 0x250   :  { %620 = vadd.xlane.f32.xlu0 %v619_v5 }
 0x251   :  { %v617_v6 = vmul.f32 %v645_v63, %v608_v4 }
 0x253   :  { %v623_v7 = vsel %vm622_vm1, %v617_v6, 0.0 }
 0x254   :  { %624 = vadd.xlane.f32.xlu0 %v623_v7 }
 0x2dd   :  { %v621_v9 = vpop.xlane.xlu0 %620 }
 0x2de   :  { %v633_v10 = vadd.f32 %v646_v8, %v621_v9 }
 0x2e0   :  { %636 = vst.msk [vmem:[%s1160_s7] sm:$0xff] %vm635_vm2, %v633_v10 }
 0x2e1   :  { %v625_v11 = vpop.xlane.xlu0 %624 }
 0x2e2   :  { %v634_v12 = vadd.f32 %v646_v8, %v625_v11 }
 0x2e4   :  { %638 = vst.msk [vmem:[%s1160_s7 + $0x8] sm:$0xf] %vm637_vm3, %v634_v12 }
 0x2e5   :  { %643 = vsyncpa [#allocation4], 1 }

</bundles_post_ra>
